<compile_context>
chip_gen: v6e
topology: v6e:2x2x1
jax: 0.10.0
libtpu: 0.0.40
codegen_flags: <defaults>
</compile_context>

<pallas_src>
import functools
import math

import jax
import jax.numpy as jnp
from jax.experimental import pallas as pl
from jax.experimental.pallas import tpu as pltpu

_LANES = 512          # lane-dense last dim (multiple of 128)
_MAX_TILE_ROWS = 1024  # (1024, 512) f32 block = 2 MiB per input


def _rel_kernel(x_ref, t_ref, o_ref, *, half_over_beta, half_beta, beta, exp_neg1):
    # Pure streaming elementwise loss + per-tile partial sum.  No masking:
    # every element of every block is a valid input element.
    x = x_ref[...].astype(jnp.float32)
    t = t_ref[...].astype(jnp.float32)
    diff = jnp.abs(x - t)
    small = diff * diff * jnp.float32(half_over_beta) - jnp.exp(-diff) + jnp.float32(exp_neg1)
    large = diff - jnp.float32(half_beta)
    loss = jnp.where(diff < jnp.float32(beta), small, large)
    # Each grid step owns its own (1,1) SMEM output block -> fully parallel axis.
    o_ref[0, 0] = jnp.sum(loss)


def _loss_sum_jnp(x_flat, t_flat, beta):
    # Plain-jnp elementwise loss sum, used only for the tiny ragged remainder
    # (< one tile of rows + < 512 trailing elements).
    diff = jnp.abs(x_flat.astype(jnp.float32) - t_flat.astype(jnp.float32))
    loss = jnp.where(
        diff < jnp.float32(beta),
        diff * diff * jnp.float32(0.5 / beta) - jnp.exp(-diff) + jnp.float32(math.exp(-1.0)),
        diff - jnp.float32(0.5 * beta),
    )
    return jnp.sum(loss)


def rel_loss(x: jax.Array, target: jax.Array, beta: float = 1.0) -> jax.Array:
    assert x.shape == target.shape
    assert x.ndim >= 1

    m = math.prod(x.shape[:-1])           # denominator of .sum(-1).mean()
    total = math.prod(x.shape)
    # Note: for zero-size inputs PyTorch's mean() would be NaN; we return 0.
    inv_m = 1.0 / float(max(m, 1))

    C = _LANES
    # reshape(-1) of a contiguous row-major array is a bitcast (no copy).
    x_flat = x.reshape(-1)
    t_flat = target.reshape(-1)

    rows_a = total // C                    # fully lane-dense rows
    if rows_a == 0:
        # Fewer than 512 elements: not worth a kernel launch.
        return _loss_sum_jnp(x_flat, t_flat, beta) * jnp.float32(inv_m)

    # --- tiling: tm rows per block (multiple of 8 when grid > 1), tm <= 1024,
    # grid >= 2 whenever possible so both v7x TensorCores get work. ---
    if rows_a >= 16:
        g = max(2, -(-rows_a // _MAX_TILE_ROWS))        # desired #tiles
        tm = max(8, ((rows_a // g) // 8) * 8)           # rows per tile
        grid = rows_a // tm
    else:
        tm = rows_a                                     # single full-array block
        grid = 1
    main_rows = grid * tm
    main_elems = main_rows * C

    # Aligned prefix processed by the kernel (no padding, no extra HBM pass).
    if main_elems == total:
        x_main, t_main = x_flat, t_flat
    else:
        x_main, t_main = x_flat[:main_elems], t_flat[:main_elems]
    x2 = x_main.reshape(main_rows, C)
    t2 = t_main.reshape(main_rows, C)

    kernel = functools.partial(
        _rel_kernel,
        half_over_beta=0.5 / float(beta),
        half_beta=0.5 * float(beta),
        beta=float(beta),
        exp_neg1=math.exp(-1.0),
    )

    partials = pl.pallas_call(
        kernel,
        out_shape=jax.ShapeDtypeStruct((grid, 1), jnp.float32),
        grid_spec=pltpu.PrefetchScalarGridSpec(
            num_scalar_prefetch=0,
            grid=(grid,),
            in_specs=[
                pl.BlockSpec((tm, C), lambda i: (i, 0)),
                pl.BlockSpec((tm, C), lambda i: (i, 0)),
            ],
            out_specs=pl.BlockSpec((1, 1), lambda i: (i, 0), memory_space=pltpu.SMEM),
        ),
        compiler_params=pltpu.CompilerParams(
            dimension_semantics=("parallel",),
        ),
    )(x2, t2)

    total_sum = jnp.sum(partials)
    if main_elems < total:
        # Ragged remainder (< tm rows + < 512 elements): tiny, handled in jnp.
        total_sum = total_sum + _loss_sum_jnp(x_flat[main_elems:], t_flat[main_elems:], beta)

    return total_sum * jnp.float32(inv_m)


def rel_loss_ref(x, target, beta: float = 1.0):
    diff = jnp.abs(x.astype(jnp.float32) - target.astype(jnp.float32))
    loss = jnp.where(
        diff < beta,
        0.5 * diff ** 2 / beta - jnp.exp(-diff) + jnp.exp(jnp.float32(-1.0)),
        diff - 0.5 * beta,
    )
    return loss.sum(axis=-1).mean()


if __name__ == "__main__":
    key = jax.random.PRNGKey(0)
    k1, k2, k3, k4, k5, k6 = jax.random.split(key, 6)

    # NCHW-like: batch=2, channels=4, spatial=16x16 (total divisible by 512).
    x = jax.random.normal(k1, (2, 4, 16, 16), dtype=jnp.float32) * 2.0
    t = jax.random.normal(k2, (2, 4, 16, 16), dtype=jnp.float32) * 2.0
    out = jax.block_until_ready(rel_loss(x, t, beta=1.0))
    ref = rel_loss_ref(x, t, beta=1.0)
    assert jnp.allclose(out, ref, rtol=1e-5, atol=1e-5), (out, ref)

    # Awkward shape: single-tile path + ragged sub-512 tail handled in wrapper.
    x2 = jax.random.normal(k3, (3, 5, 37), dtype=jnp.float32)
    t2 = jax.random.normal(k4, (3, 5, 37), dtype=jnp.float32)
    out2 = jax.block_until_ready(rel_loss(x2, t2, beta=1.0))
    ref2 = rel_loss_ref(x2, t2, beta=1.0)
    assert jnp.allclose(out2, ref2, rtol=1e-5, atol=1e-5), (out2, ref2)

    # Multi-tile path (grid >= 2) with leftover rows + ragged tail.
    x3 = jax.random.normal(k5, (20, 3, 700), dtype=jnp.float32)
    t3 = jax.random.normal(k6, (20, 3, 700), dtype=jnp.float32)
    out3 = jax.block_until_ready(rel_loss(x3, t3, beta=1.0))
    ref3 = rel_loss_ref(x3, t3, beta=1.0)
    assert jnp.allclose(out3, ref3, rtol=1e-4, atol=1e-4), (out3, ref3)

    print("KERNEL_OK")
</pallas_src>

<mosaic_0001>
module attributes {stable_mosaic.version = 11 : i64} {
  func.func @_rel_kernel(%arg0: i32, %arg1: memref<4x512xf32, #tpu.memory_space<vmem>>, %arg2: memref<4x512xf32, #tpu.memory_space<vmem>>, %arg3: memref<1x1xf32, #tpu.memory_space<smem>>) attributes {dimension_semantics = [#tpu.dimension_semantics<parallel>], iteration_bounds = array<i64: 1>, scalar_prefetch = 0 : i64, scratch_operands = 0 : i64, tpu.core_type = #tpu.core_type<tc>, window_params = [{transform_indices = @transform_0, window_bounds = array<i64: 4, 512>}, {transform_indices = @transform_1, window_bounds = array<i64: 4, 512>}, {transform_indices = @transform_2, window_bounds = array<i64: 1, 1>}]} {
    %c0 = arith.constant 0 : index
    %c0_0 = arith.constant 0 : index
    %0 = vector.load %arg1[%c0, %c0_0] : memref<4x512xf32, #tpu.memory_space<vmem>>, vector<4x512xf32>
    %c0_1 = arith.constant 0 : index
    %c0_2 = arith.constant 0 : index
    %1 = vector.load %arg2[%c0_1, %c0_2] : memref<4x512xf32, #tpu.memory_space<vmem>>, vector<4x512xf32>
    %2 = arith.subf %0, %1 : vector<4x512xf32>
    %3 = math.absf %2 : vector<4x512xf32>
    %4 = arith.mulf %3, %3 : vector<4x512xf32>
    %cst = arith.constant 5.000000e-01 : f32
    %5 = vector.broadcast %cst : f32 to vector<4x512xf32>
    %6 = arith.mulf %4, %5 : vector<4x512xf32>
    %cst_3 = arith.constant 0.000000e+00 : f32
    %7 = vector.broadcast %cst_3 : f32 to vector<4x512xf32>
    %8 = arith.subf %7, %3 : vector<4x512xf32>
    %9 = math.exp %8 : vector<4x512xf32>
    %10 = arith.subf %6, %9 : vector<4x512xf32>
    %cst_4 = arith.constant 0.36787945 : f32
    %11 = vector.broadcast %cst_4 : f32 to vector<4x512xf32>
    %12 = arith.addf %10, %11 : vector<4x512xf32>
    %cst_5 = arith.constant 5.000000e-01 : f32
    %13 = vector.broadcast %cst_5 : f32 to vector<4x512xf32>
    %14 = arith.subf %3, %13 : vector<4x512xf32>
    %cst_6 = arith.constant 1.000000e+00 : f32
    %15 = vector.broadcast %cst_6 : f32 to vector<4x512xf32>
    %16 = arith.cmpf olt, %3, %15 : vector<4x512xf32>
    %17 = arith.select %16, %12, %14 : vector<4x512xi1>, vector<4x512xf32>
    %18 = vector.shape_cast %17 : vector<4x512xf32> to vector<1x4x512xf32>
    %cst_7 = arith.constant dense<0.000000e+00> : vector<1xf32>
    %19 = vector.multi_reduction <add>, %18, %cst_7 [1, 2] : vector<1x4x512xf32> to vector<1xf32>
    %20 = vector.shape_cast %19 : vector<1xf32> to vector<1x1x1xf32>
    %21 = vector.extract %20[0, 0, 0] : f32 from vector<1x1x1xf32>
    %c0_8 = arith.constant 0 : index
    %c0_9 = arith.constant 0 : index
    %22 = memref.load %arg3[%c0_8, %c0_9] : memref<1x1xf32, #tpu.memory_space<smem>>
    memref.store %21, %arg3[%c0_8, %c0_9] : memref<1x1xf32, #tpu.memory_space<smem>>
    return
  }
  func.func @transform_0(%arg0: i32) -> (i32, i32) {
    %c0_i32 = arith.constant 0 : i32
    %c0_i32_0 = arith.constant 0 : i32
    return %arg0, %c0_i32 : i32, i32
  }
  func.func @transform_1(%arg0: i32) -> (i32, i32) {
    %c0_i32 = arith.constant 0 : i32
    %c0_i32_0 = arith.constant 0 : i32
    return %arg0, %c0_i32 : i32, i32
  }
  func.func @transform_2(%arg0: i32) -> (i32, i32) {
    %c0_i32 = arith.constant 0 : i32
    %c0_i32_0 = arith.constant 0 : i32
    return %arg0, %c0_i32 : i32, i32
  }
}

</mosaic_0001>

<bundles_post_ra>
// kernel: tpu_custom_call.1
= control target key start
LH: loop header
LB: loop body
LE: loop exit
PB: predicated region body
PF: predicated region fallthrough
CT: control target
= control target key end

     0   :  { %7 = vsyncpa [#allocation3], 0  ;;  %s196_s0 = inlined_call_operand.hbm [shape: f32[4,512], index: 0, kind: input, shape index: {}]   ;;  %s197_s1 = inlined_call_operand.hbm [shape: f32[4,512], index: 1, kind: input, shape index: {}]   ;;  %s198_s2 = inlined_call_operand.hbm [shape: f32[1,1], index: 2, kind: output, shape index: {}]  }
   0x1   :  { %8 = vsyncpa [#allocation6], 0 }
   0x2   :  { %9 = vsyncpa [#allocation4], 0  ;;  %s169_s9 = smov [#allocation2]   ;;  %s170_s11 = smov [#allocation5]  }
   0x3   :  { %s16_s10 = sshll.u32 %s169_s9, 4  ;;  %s26_s12 = sshll.u32 %s170_s11, 4  ;;  %s17_s10 = int_to_ptr.vmem [resolvable:$true] %s16_s10  ;;  %s27_s12 = int_to_ptr.vmem [resolvable:$true] %s26_s12 }
   0x4   :  { %s123_s13 = scalar_lea.vmem %s17_s10, 256  ;;  %p128_p1 = scmp.lt.s32.totalorder %s17_s10, %s17_s10 }
   0x5   :  { %p124_p0 = scmp.ne.s32.totalorder %s17_s10, %s123_s13  ;;  %p129_p2 = scmp.lt.s32.totalorder %s123_s13, %s123_s13 }
   0x7   :  { %p130_p3 = por %p129_p2, %p128_p1 }
   0x9   :  { %p131_p4 = pnand %p130_p3, %p124_p0 }
   0xb   :  { %134 = shalt.err (!%p131_p4)
}
   0xc   :  { %19 = dma.hbm_to_vmem [thread:$0]  %s196_s0, 256, %s17_s10, [#allocation3]  }
   0xd   :  { %s143_s16 = scalar_lea.vmem %s27_s12, 256  ;;  %p148_p6 = scmp.lt.s32.totalorder %s27_s12, %s27_s12 }
   0xe   :  { %p144_p5 = scmp.ne.s32.totalorder %s27_s12, %s143_s16  ;;  %p149_p7 = scmp.lt.s32.totalorder %s143_s16, %s143_s16 }
  0x10   :  { %p150_p8 = por %p149_p7, %p148_p6 }
  0x12   :  { %p151_p9 = pnand %p150_p8, %p144_p5 }
  0x14   :  { %154 = shalt.err (!%p151_p9)
}
  0x15   :  { %29 = dma.hbm_to_vmem [thread:$0]  %s197_s1, 256, %s27_s12, [#allocation6]  }
  0x16   :  { %163 = dma.done.wait [#allocation3], 256  }
  0x17   :  { %164 = vsyncadd [#allocation3], 4294967040 }
  0x18   :  { %165 = dma.done.wait [#allocation6], 256  }
  0x19   :  { %166 = vsyncadd [#allocation6], 4294967040  ;;  %v36_v0 = vld [vmem:[#allocation2] sm:$0xff]  ;;  %v37_v1 = vld [vmem:[#allocation2 + $0x8] sm:$0xff]  ;;  %vm70_vm2 = vcmask 1043456   ;;  %s171_s1 = smov [#allocation7]  }
  0x1a   :  { %v38_v2 = vld [vmem:[#allocation5] sm:$0xff]  ;;  %v39_v3 = vld [vmem:[#allocation5 + $0x8] sm:$0xff] }
  0x1b   :  { %v40_v4 = vsub.f32 %v36_v0, %v38_v2  ;;  %v41_v5 = vsub.f32 %v37_v1, %v39_v3 }
  0x1d   :  { %v42_v6 = vand.u32 2147483647, %v40_v4  ;;  %v43_v7 = vand.u32 2147483647, %v41_v5 }
  0x1f   :  { %v48_v8 = vsub.f32 0.0, %v42_v6  ;;  %v49_v9 = vsub.f32 0.0, %v43_v7  ;;  %v44_v12 = vmul.f32 %v42_v6, %v42_v6  ;;  %v45_v13 = vmul.f32 %v43_v7, %v43_v7 }
  0x20   :  { %v104_v19 = vadd.f32 -0.5, %v42_v6  ;;  %v105_v21 = vadd.f32 -0.5, %v43_v7  ;;  %vm60_vm0 = vcmp.lt.f32.partialorder %v42_v6, 1.0  ;;  %vm61_vm1 = vcmp.lt.f32.partialorder %v43_v7, 1.0 }
  0x21   :  { %v50_v10 = vmul.f32 1.442695, %v48_v8  ;;  %v52_v11 = vmul.f32 1.442695, %v49_v9  ;;  %v46_v14 = vmul.f32 0.5, %v44_v12  ;;  %v47_v15 = vmul.f32 0.5, %v45_v13 }
  0x23   :  { %111 = vpow2.f32 %v50_v10 }
  0x24   :  { %113 = vpow2.f32 %v52_v11 }
  0x30   :  { %v112_v16 = vpop.eup %111 }
  0x31   :  { %v114_v17 = vpop.eup %113  ;;  %v54_v18 = vsub.f32 %v46_v14, %v112_v16 }
  0x32   :  { %v55_v20 = vsub.f32 %v47_v15, %v114_v17 }
  0x33   :  { %v56_v22 = vadd.f32 0.36787945, %v54_v18 }
  0x34   :  { %v57_v23 = vadd.f32 0.36787945, %v55_v20 }
  0x35   :  { %v62_v24 = vsel %vm60_vm0, %v56_v22, %v104_v19 }
  0x36   :  { %v63_v25 = vsel %vm61_vm1, %v57_v23, %v105_v21  ;;  %v66_v26 = vcombine.high %v62_v24, %v62_v24  ;;  %v71_v27 = vsel %vm70_vm2, %v62_v24, 0.0 }
  0x37   :  { %v67_v28 = vcombine.high %v63_v25, %v63_v25  ;;  %v74_v30 = vsel %vm70_vm2, %v63_v25, 0.0 }
  0x38   :  { %v72_v29 = vsel %vm70_vm2, %v66_v26, 0.0 }
  0x39   :  { %v73_v31 = vadd.f32 %v72_v29, %v71_v27  ;;  %v76_v32 = vsel %vm70_vm2, %v67_v28, 0.0 }
  0x3b   :  { %v75_v33 = vadd.f32 %v74_v30, %v73_v31 }
  0x3d   :  { %v77_v34 = vadd.f32 %v76_v32, %v75_v33 }
  0x3f   :  { %78 = vadd.xlane.f32.xlu0 %v77_v34 }
  0xc8   :  { %v79_v35 = vpop.xlane.xlu0 %78 }
  0xc9   :  { %v80_v36 = vrot.slane %v79_v35, 4 }
  0xcb   :  { %v81_v37 = vadd.f32 %v80_v36, %v79_v35 }
  0xcd   :  { %v82_v38 = vrot.slane %v81_v37, 2 }
  0xcf   :  { %v83_v39 = vadd.f32 %v82_v38, %v81_v37 }
  0xd1   :  { %v84_v40 = vrot.slane %v83_v39, 1 }
  0xd3   :  { %v85_v41 = vadd.f32 %v84_v40, %v83_v39 }
  0xd5   :  { %106 = vpush %v85_v41 }
 0x106   :  { %s107_s0 = spop %106 }
 0x107   :  { %88 = sst [smem:[#allocation7]] %s107_s0 }
 0x108   :  { %96 = dma.smem_to_hbm %s171_s1, 16, %s198_s2, [#allocation4]  }
 0x109   :  { %167 = dma.done.wait [#allocation4], 16  }
 0x10a   :  { %168 = vsyncadd [#allocation4], 4294967280 }
 0x10b   :  { %100 = sfence }
 0x10c   :  { %101 = vsyncpa [#allocation3], 1 }
 0x10d   :  { %102 = vsyncpa [#allocation6], 1 }
 0x10e   :  { %103 = vsyncpa [#allocation4], 1 }

</bundles_post_ra>
